<compile_context>
chip_gen: v6e
topology: v6e:2x2x1
jax: 0.10.0
libtpu: 0.0.40
codegen_flags: <defaults>
</compile_context>

<pallas_src>
import functools
import math

import jax
import jax.numpy as jnp
from jax.experimental import pallas as pl
from jax.experimental.pallas import tpu as pltpu

_LANES = 128  # vreg lane width


def _vmem_capacity_bytes():
    """Physical VMEM per core; falls back to the v7x (smallest) size."""
    try:
        cap = int(pltpu.get_tpu_info().vmem_capacity_bytes)
        if cap > 0:
            return cap
    except Exception:
        pass
    return 64 * 1024 * 1024


def _normalize_kernel(x_ref, mean_ref, inv_ref, o_ref, *, bound, subtract_mean, clip):
    # x tile: (TB, DT) in the caller's dtype; parameter rows: (1, DT) float32,
    # VMEM-resident across the whole row loop (index_map always returns row 0).
    x = x_ref[...].astype(jnp.float32)
    inv = inv_ref[...]                       # precomputed 1/(std+eps), (1, DT)
    if subtract_mean:
        y = (x - mean_ref[...]) * inv
    else:
        y = x * inv
    if clip:
        y = jnp.clip(y, -bound, bound)
    o_ref[...] = y.astype(o_ref.dtype)


def online_mean_std_forward(x, mean, std, *, eps=1e-5, bound=10.0,
                            subtract_mean=True, clip=False):
    """Pallas implementation of OnlineMeanStd.forward (normalization hot path)."""
    x = jnp.asarray(x)
    orig_shape = x.shape
    D = orig_shape[-1]
    B = int(math.prod(orig_shape[:-1])) if len(orig_shape) > 1 else 1
    x2 = x.reshape(B, D)
    out_dtype = x.dtype

    mean1 = jnp.asarray(mean, jnp.float32).reshape(-1)
    std1 = jnp.asarray(std, jnp.float32).reshape(-1)
    if len(orig_shape) >= 2 and mean1.shape[0] not in (1, D):
        raise AssertionError(f"got shape={orig_shape} but expected: {mean1.shape}")
    if mean1.shape[0] != D:
        mean1 = jnp.broadcast_to(mean1, (D,))
    if std1.shape[0] != D:
        std1 = jnp.broadcast_to(std1, (D,))
    # Hoisted out of the per-tile loop: O(D) XLA op on the tiny parameter row.
    inv1 = 1.0 / (std1 + jnp.float32(eps))

    # ---- Lane-dense folding for tiny feature dims (free reshape, no pad) ----
    if (D % _LANES != 0) and (_LANES % D == 0) and ((B * D) % _LANES == 0):
        rep = _LANES // D
        rows, Dk = (B * D) // _LANES, _LANES
        x2 = x2.reshape(rows, Dk)                      # contiguous -> free
        mean2 = jnp.tile(mean1, rep).reshape(1, Dk)
        inv2 = jnp.tile(inv1, rep).reshape(1, Dk)
        fold = True
    else:
        rows, Dk = B, D
        mean2 = mean1.reshape(1, Dk)
        inv2 = inv1.reshape(1, Dk)
        fold = False

    # ---- Generation-aware VMEM budget -> tile sizes ------------------------
    in_bytes = x2.dtype.itemsize
    out_bytes = jnp.dtype(out_dtype).itemsize
    sub = {4: 8, 2: 16, 1: 32}.get(in_bytes, 8)        # native sublane packing

    vmem_cap = _vmem_capacity_bytes()                  # 64 MiB v7x, 128 MiB v5e/v6e
    budget = max(8 << 20, int(vmem_cap * 0.35))        # ~22 MiB v7x, ~45 MiB v6e
    vmem_limit = min(int(vmem_cap * 3 // 4), 112 << 20)

    per_elem = 2 * (in_bytes + out_bytes)              # double-buffered in + out

    # Feature-axis tile: full extent unless even a sublane-min row tile would
    # blow the budget (then use 128-lane-multiple chunks).
    if Dk <= _LANES or sub * Dk * per_elem <= budget:
        dt = Dk
    else:
        max_lanes = max(_LANES, budget // (sub * per_elem))
        dt = (max_lanes // _LANES) * _LANES
        if dt >= Dk:
            dt = Dk

    # Row tile: as big as the budget allows (no artificial row cap),
    # aligned to the dtype's sublane packing unless it covers all rows.
    per_row = dt * per_elem
    tb = max(sub, budget // per_row)
    if tb >= rows:
        tb = rows
    else:
        tb = max(sub, (tb // sub) * sub)

    grid = (pl.cdiv(rows, tb), pl.cdiv(Dk, dt))

    kernel = functools.partial(
        _normalize_kernel,
        bound=float(bound), subtract_mean=bool(subtract_mean), clip=bool(clip))

    out2 = pl.pallas_call(
        kernel,
        out_shape=jax.ShapeDtypeStruct((rows, Dk), out_dtype),
        grid=grid,
        in_specs=[
            pl.BlockSpec((tb, dt), lambda i, j: (i, j)),   # x tile (pipelined)
            pl.BlockSpec((1, dt), lambda i, j: (0, j)),    # mean row (resident)
            pl.BlockSpec((1, dt), lambda i, j: (0, j)),    # 1/(std+eps) row
        ],
        out_specs=pl.BlockSpec((tb, dt), lambda i, j: (i, j)),
        compiler_params=pltpu.CompilerParams(
            dimension_semantics=("parallel", "parallel"),
            vmem_limit_bytes=vmem_limit),
    )(x2, mean2, inv2)

    out = out2.reshape(B, D) if fold else out2
    return out.reshape(orig_shape)


if __name__ == "__main__":
    key = jax.random.PRNGKey(0)
    k1, k2, k3 = jax.random.split(key, 3)

    # --- Primary check: matches the original module's small demo shape -------
    batch, feat = 8, 32
    mean = jnp.zeros((feat,), jnp.float32)   # OnlineMeanStd.__init__: torch.zeros
    std = jnp.ones((feat,), jnp.float32)     # torch.ones
    x = jax.random.normal(key, (batch, feat), dtype=jnp.float32) * 5.0
    out = jax.block_until_ready(
        online_mean_std_forward(x, mean, std, eps=1e-5, bound=10.0,
                                subtract_mean=True, clip=True))
    ref = jnp.clip((x - mean[None, :]) / (std[None, :] + 1e-5), -10.0, 10.0)
    assert out.shape == (batch, feat) and out.dtype == jnp.float32
    assert jnp.allclose(out, ref, atol=1e-5, rtol=1e-5)

    # --- Lane-dense direct mode (D multiple of 128) with row tiling ----------
    B2, D2 = 64, 256
    x2 = jax.random.normal(k1, (B2, D2), dtype=jnp.float32) * 3.0
    mean2 = jax.random.normal(k2, (D2,), dtype=jnp.float32)
    std2 = jax.random.uniform(k3, (D2,), dtype=jnp.float32, minval=0.5, maxval=2.0)
    out2 = jax.block_until_ready(
        online_mean_std_forward(x2, mean2, std2, eps=1e-5, bound=10.0,
                                subtract_mean=True, clip=True))
    ref2 = jnp.clip((x2 - mean2[None, :]) / (std2[None, :] + 1e-5), -10.0, 10.0)
    assert jnp.allclose(out2, ref2, atol=1e-5, rtol=1e-5)

    # --- Ragged feature dim (no pad/slice HBM passes; masked lanes in-kernel)
    B3, D3 = 16, 33
    x3 = jax.random.normal(k2, (B3, D3), dtype=jnp.float32)
    mean3 = jax.random.normal(k3, (D3,), dtype=jnp.float32)
    std3 = jax.random.uniform(k1, (D3,), dtype=jnp.float32, minval=0.5, maxval=2.0)
    out3 = jax.block_until_ready(
        online_mean_std_forward(x3, mean3, std3, eps=1e-5, bound=10.0,
                                subtract_mean=True, clip=False))
    ref3 = (x3 - mean3[None, :]) / (std3[None, :] + 1e-5)
    assert jnp.allclose(out3, ref3, atol=1e-5, rtol=1e-5)

    # --- bf16 input stays bf16 (no wrapper up-cast), no mean-subtract --------
    xb = jax.random.normal(k1, (64, 128), dtype=jnp.bfloat16)
    outb = jax.block_until_ready(
        online_mean_std_forward(xb, jnp.zeros((128,)), jnp.ones((128,)),
                                subtract_mean=False, clip=False))
    refb = (xb.astype(jnp.float32) / (1.0 + 1e-5)).astype(jnp.bfloat16)
    assert outb.dtype == jnp.bfloat16
    assert jnp.allclose(outb.astype(jnp.float32), refb.astype(jnp.float32),
                        atol=1e-2, rtol=1e-2)

    print("KERNEL_OK")
</pallas_src>

<mosaic_0001>
module attributes {stable_mosaic.version = 11 : i64} {
  func.func @_normalize_kernel(%arg0: i32, %arg1: i32, %arg2: memref<2x128xf32, #tpu.memory_space<vmem>>, %arg3: memref<1x128xf32, #tpu.memory_space<vmem>>, %arg4: memref<1x128xf32, #tpu.memory_space<vmem>>, %arg5: memref<2x128xf32, #tpu.memory_space<vmem>>) attributes {dimension_semantics = [#tpu.dimension_semantics<parallel>, #tpu.dimension_semantics<parallel>], iteration_bounds = array<i64: 1, 1>, scalar_prefetch = 0 : i64, scratch_operands = 0 : i64, tpu.core_type = #tpu.core_type<tc>, window_params = [{transform_indices = @transform_0, window_bounds = array<i64: 2, 128>}, {transform_indices = @transform_1, window_bounds = array<i64: 1, 128>}, {transform_indices = @transform_2, window_bounds = array<i64: 1, 128>}, {transform_indices = @transform_3, window_bounds = array<i64: 2, 128>}]} {
    %c0 = arith.constant 0 : index
    %c0_0 = arith.constant 0 : index
    %0 = vector.load %arg2[%c0, %c0_0] : memref<2x128xf32, #tpu.memory_space<vmem>>, vector<2x128xf32>
    %c0_1 = arith.constant 0 : index
    %c0_2 = arith.constant 0 : index
    %1 = vector.load %arg4[%c0_1, %c0_2] : memref<1x128xf32, #tpu.memory_space<vmem>>, vector<1x128xf32>
    %c0_3 = arith.constant 0 : index
    %c0_4 = arith.constant 0 : index
    %2 = vector.load %arg3[%c0_3, %c0_4] : memref<1x128xf32, #tpu.memory_space<vmem>>, vector<1x128xf32>
    %3 = vector.broadcast %2 : vector<1x128xf32> to vector<2x128xf32>
    %4 = arith.subf %0, %3 : vector<2x128xf32>
    %5 = vector.broadcast %1 : vector<1x128xf32> to vector<2x128xf32>
    %6 = arith.mulf %4, %5 : vector<2x128xf32>
    %cst = arith.constant -1.000000e+01 : f32
    %cst_5 = arith.constant 1.000000e+01 : f32
    %7 = vector.broadcast %cst : f32 to vector<2x128xf32>
    %8 = arith.maximumf %7, %6 : vector<2x128xf32>
    %9 = vector.broadcast %cst_5 : f32 to vector<2x128xf32>
    %10 = arith.minimumf %9, %8 : vector<2x128xf32>
    %c0_6 = arith.constant 0 : index
    %c0_7 = arith.constant 0 : index
    %11 = vector.load %arg5[%c0_6, %c0_7] : memref<2x128xf32, #tpu.memory_space<vmem>>, vector<2x128xf32>
    tpu.vector_store %arg5[%c0_6, %c0_7], %10 {strides = array<i32>} : memref<2x128xf32, #tpu.memory_space<vmem>>, vector<2x128xf32>,
    return
  }
  func.func @transform_0(%arg0: i32, %arg1: i32) -> (i32, i32) {
    %c0_i32 = arith.constant 0 : i32
    return %arg0, %arg1 : i32, i32
  }
  func.func @transform_1(%arg0: i32, %arg1: i32) -> (i32, i32) {
    %c0_i32 = arith.constant 0 : i32
    %c0_i32_0 = arith.constant 0 : i32
    return %c0_i32, %arg1 : i32, i32
  }
  func.func @transform_2(%arg0: i32, %arg1: i32) -> (i32, i32) {
    %c0_i32 = arith.constant 0 : i32
    %c0_i32_0 = arith.constant 0 : i32
    return %c0_i32, %arg1 : i32, i32
  }
  func.func @transform_3(%arg0: i32, %arg1: i32) -> (i32, i32) {
    %c0_i32 = arith.constant 0 : i32
    return %arg0, %arg1 : i32, i32
  }
}

</mosaic_0001>

<bundles_post_ra>
// kernel: tpu_custom_call.1
= control target key start
LH: loop header
LB: loop body
LE: loop exit
PB: predicated region body
PF: predicated region fallthrough
CT: control target
= control target key end

     0   :  { %8 = vsyncpa [#allocation3], 0  ;;  %s145_s0 = inlined_call_operand.hbm [shape: f32[2,128], index: 0, kind: input, shape index: {}]   ;;  %s146_s1 = inlined_call_operand.vmem [shape: f32[1,128], index: 1, kind: input, shape index: {}]   ;;  %s147_s2 = inlined_call_operand.vmem [shape: f32[1,128], index: 2, kind: input, shape index: {}]   ;;  %s148_s3 = inlined_call_operand.hbm [shape: f32[2,128], index: 3, kind: output, shape index: {}]  }
   0x1   :  { %9 = vsyncpa [#allocation4], 0  ;;  %s111_s12 = smov [#allocation2]  }
   0x2   :  { %s16_s13 = sshll.u32 %s111_s12, 4  ;;  %s17_s13 = int_to_ptr.vmem [resolvable:$true] %s16_s13 }
   0x3   :  { %s75_s14 = scalar_lea.vmem %s17_s13, 32  ;;  %p80_p1 = scmp.lt.s32.totalorder %s17_s13, %s17_s13 }
   0x4   :  { %p76_p0 = scmp.ne.s32.totalorder %s17_s13, %s75_s14  ;;  %p81_p2 = scmp.lt.s32.totalorder %s75_s14, %s75_s14 }
   0x6   :  { %p82_p3 = por %p81_p2, %p80_p1 }
   0x8   :  { %p83_p4 = pnand %p82_p3, %p76_p0 }
   0xa   :  { %86 = shalt.err (!%p83_p4)
}
   0xb   :  { %19 = dma.hbm_to_vmem [thread:$0]  %s145_s0, 32, %s17_s13, [#allocation3]  }
   0xc   :  { %107 = dma.done.wait [#allocation3], 32  }
   0xd   :  { %108 = vsyncadd [#allocation3], 4294967264  ;;  %v27_v0 = vld [vmem:[#allocation2] sm:$0x3]  ;;  %s112_s21 = smov [#allocation5]  }
   0xe   :  { %v63_v1 = vld [vmem:[%s147_s2] ss:$0 sm:$0xff]  ;;  %s53_s22 = sshll.u32 %s112_s21, 4  ;;  %s54_s22 = int_to_ptr.vmem [resolvable:$true] %s53_s22 }
   0xf   :  { %v62_v2 = vld [vmem:[%s146_s1] ss:$0 sm:$0xff]  ;;  %s87_s23 = scalar_lea.vmem %s54_s22, 32  ;;  %p92_p6 = scmp.lt.s32.totalorder %s54_s22, %s54_s22 }
  0x10   :  { %v36_v3 = vsub.f32 %v27_v0, %v62_v2  ;;  %p88_p5 = scmp.ne.s32.totalorder %s54_s22, %s87_s23  ;;  %p93_p7 = scmp.lt.s32.totalorder %s87_s23, %s87_s23 }
  0x12   :  { %v43_v4 = vmul.f32 %v63_v1, %v36_v3  ;;  %p94_p8 = por %p93_p7, %p92_p6 }
  0x14   :  { %v64_v5 = vclamps-f32 %v43_v4, 10.0  ;;  %p95_p9 = pnand %p94_p8, %p88_p5 }
  0x16   :  { %46 = vst [vmem:[#allocation5] sm:$0x3] %v64_v5 }
  0x17   :  { %98 = shalt.err (!%p95_p9)
}
  0x18   :  { %56 = dma.vmem_to_hbm [thread:$0]  %s54_s22, 32, %s148_s3, [#allocation4]  }
  0x19   :  { %109 = dma.done.wait [#allocation4], 32  }
  0x1a   :  { %110 = vsyncadd [#allocation4], 4294967264 }
  0x1b   :  { %60 = vsyncpa [#allocation3], 1 }
  0x1c   :  { %61 = vsyncpa [#allocation4], 1 }

</bundles_post_ra>
